<compile_context>
chip_gen: v7x
topology: tpu7x:2x2x1
jax: 0.10.0
libtpu: 0.0.40
codegen_flags: <defaults>
</compile_context>

<pallas_src>
import functools

import jax
import jax.numpy as jnp
from jax.experimental import pallas as pl
from jax.experimental.pallas import tpu as pltpu

EPS = 1e-5
LANE = 128
ROW_ALIGN = 16          # sublane alignment valid for both f32 (8) and bf16 (16)


def _round_up(x: int, m: int) -> int:
    return (x + m - 1) // m * m


# --------------------------------------------------------------------------
# Kernels
# --------------------------------------------------------------------------
def _linear_stats_kernel(x_ref, w_ref, z_ref, st_ref):
    """z = x @ w (f32 accumulate); store z in z_ref.dtype; emit [sum; sumsq]."""
    z = jnp.dot(x_ref[...], w_ref[...], preferred_element_type=jnp.float32)
    z_ref[...] = z.astype(z_ref.dtype)
    s = jnp.sum(z, axis=0, keepdims=True)
    sq = jnp.sum(z * z, axis=0, keepdims=True)
    st_ref[0] = jnp.concatenate([s, sq], axis=0)            # (2, D) store


def _bn_relu_linear_stats_kernel(z1_ref, sc_ref, sh_ref, w_ref, z2_ref, st_ref,
                                 *, mm_dtype):
    """a = relu(z1*scale + shift); z2 = a @ w; emit [sum; sumsq] of z2 (f32)."""
    a = jnp.maximum(z1_ref[...].astype(jnp.float32) * sc_ref[...] + sh_ref[...],
                    0.0)
    z2 = jnp.dot(a.astype(mm_dtype), w_ref[...],
                 preferred_element_type=jnp.float32)
    z2_ref[...] = z2.astype(z2_ref.dtype)
    s = jnp.sum(z2, axis=0, keepdims=True)
    sq = jnp.sum(z2 * z2, axis=0, keepdims=True)
    st_ref[0] = jnp.concatenate([s, sq], axis=0)


def _bn_relu_kernel(z_ref, sc_ref, sh_ref, o_ref):
    o_ref[...] = jnp.maximum(
        z_ref[...].astype(jnp.float32) * sc_ref[...] + sh_ref[...], 0.0)


# --------------------------------------------------------------------------
# Wrapper
# --------------------------------------------------------------------------
def _fold_bn(stats, n, gamma, beta, *, pad_row=None, pad_count=0):
    """Fold per-tile [sum; sumsq] into BN scale/shift (f32, biased var).

    pad_row / pad_count: constant row contributed by each padded batch row;
    subtracted before normalizing (stats sums run over n_pad rows).
    """
    s = jnp.sum(stats[:, 0, :], axis=0, keepdims=True)       # [1, D]
    sq = jnp.sum(stats[:, 1, :], axis=0, keepdims=True)      # [1, D]
    if pad_count:
        s = s - pad_count * pad_row
        sq = sq - pad_count * (pad_row * pad_row)
    mu = s / n
    var = jnp.maximum(sq / n - mu * mu, 0.0)                  # guard cancellation
    inv = jax.lax.rsqrt(var + EPS)
    scale = gamma * inv
    shift = beta - mu * scale
    return scale, shift


def apply_node_func(h, w1, b1, g1, be1, w2, b2, g2, be2,
                    *, tile_n=1024, matmul_dtype=jnp.bfloat16):
    # Linear biases are mathematically dead under batch-stat (training-mode)
    # BatchNorm — the mean subtraction removes any per-feature constant.
    # TODO(synk): eval-mode BN (running_mean/var) would require keeping b1/b2.
    del b1, b2

    f32 = jnp.float32
    N, in_dim = h.shape
    hidden = w1.shape[1]
    out_dim = w2.shape[1]

    hid_p = _round_up(hidden, LANE)
    out_p = _round_up(out_dim, LANE)

    inter_dtype = matmul_dtype                 # HBM dtype of z1/z2 intermediates
    ib = jnp.dtype(inter_dtype).itemsize
    mm_b = jnp.dtype(matmul_dtype).itemsize

    # ---- VMEM-aware tile sizing ---------------------------------------------
    # Double-buffered stage-2 working set per row ~ (hid_p + out_p) lanes of
    # input/output plus the f32 compute copy; keep it well under the scoped
    # VMEM budget on every generation (v7x has only 64 MiB physical / core).
    per_row_bytes = 2 * (hid_p + out_p) * (ib + 4)
    vmem_budget = 8 * 1024 * 1024
    max_rows = max(ROW_ALIGN,
                   (vmem_budget // max(per_row_bytes, 1)) // ROW_ALIGN * ROW_ALIGN)
    tile_n = min(tile_n, max_rows)
    tile_n = _round_up(min(tile_n, _round_up(N, ROW_ALIGN)), ROW_ALIGN)
    n_pad = _round_up(N, tile_n)
    ntiles = n_pad // tile_n
    pad_count = n_pad - N

    # ---- wrapper-side layout plumbing: lane-dense, matmul-dtype operands -----
    hp = jnp.zeros((n_pad, in_dim), matmul_dtype).at[:N].set(h.astype(matmul_dtype))
    w1p = jnp.zeros((in_dim, hid_p), matmul_dtype).at[:, :hidden].set(
        w1.astype(matmul_dtype))
    w2p = jnp.zeros((hid_p, out_p), matmul_dtype).at[:hidden, :out_dim].set(
        w2.astype(matmul_dtype))
    # gamma/beta zero-padded so padded lanes stay exactly zero through BN+ReLU.
    g1p = jnp.zeros((1, hid_p), f32).at[:, :hidden].set(g1.reshape(1, -1).astype(f32))
    be1p = jnp.zeros((1, hid_p), f32).at[:, :hidden].set(be1.reshape(1, -1).astype(f32))
    g2p = jnp.zeros((1, out_p), f32).at[:, :out_dim].set(g2.reshape(1, -1).astype(f32))
    be2p = jnp.zeros((1, out_p), f32).at[:, :out_dim].set(be2.reshape(1, -1).astype(f32))

    cparams = pltpu.CompilerParams(
        dimension_semantics=("parallel",),
        vmem_limit_bytes=32 * 1024 * 1024)

    # ---- stage 1: z1 = h @ w1, per-tile [sum; sumsq] -------------------------
    z1, st1 = pl.pallas_call(
        _linear_stats_kernel,
        grid=(ntiles,),
        in_specs=[
            pl.BlockSpec((tile_n, in_dim), lambda i: (i, 0)),
            pl.BlockSpec((in_dim, hid_p), lambda i: (0, 0)),
        ],
        out_specs=[
            pl.BlockSpec((tile_n, hid_p), lambda i: (i, 0)),
            pl.BlockSpec((1, 2, hid_p), lambda i: (i, 0, 0)),
        ],
        out_shape=[
            jax.ShapeDtypeStruct((n_pad, hid_p), inter_dtype),
            jax.ShapeDtypeStruct((ntiles, 2, hid_p), f32),
        ],
        compiler_params=cparams,
        cost_estimate=pl.CostEstimate(
            flops=2 * n_pad * in_dim * hid_p + 3 * n_pad * hid_p,
            transcendentals=0,
            bytes_accessed=(n_pad * in_dim * mm_b + in_dim * hid_p * mm_b
                            + n_pad * hid_p * ib + ntiles * 2 * hid_p * 4)),
    )(hp, w1p)

    sc1, sh1 = _fold_bn(st1, N, g1p, be1p)

    # ---- stage 2: a1 = relu(BN1(z1)); z2 = a1 @ w2, per-tile [sum; sumsq] ----
    z2, st2 = pl.pallas_call(
        functools.partial(_bn_relu_linear_stats_kernel, mm_dtype=matmul_dtype),
        grid=(ntiles,),
        in_specs=[
            pl.BlockSpec((tile_n, hid_p), lambda i: (i, 0)),
            pl.BlockSpec((1, hid_p), lambda i: (0, 0)),
            pl.BlockSpec((1, hid_p), lambda i: (0, 0)),
            pl.BlockSpec((hid_p, out_p), lambda i: (0, 0)),
        ],
        out_specs=[
            pl.BlockSpec((tile_n, out_p), lambda i: (i, 0)),
            pl.BlockSpec((1, 2, out_p), lambda i: (i, 0, 0)),
        ],
        out_shape=[
            jax.ShapeDtypeStruct((n_pad, out_p), inter_dtype),
            jax.ShapeDtypeStruct((ntiles, 2, out_p), f32),
        ],
        compiler_params=cparams,
        cost_estimate=pl.CostEstimate(
            flops=2 * n_pad * hid_p * out_p + 6 * n_pad * hid_p,
            transcendentals=0,
            bytes_accessed=(n_pad * hid_p * ib + hid_p * out_p * mm_b
                            + n_pad * out_p * ib + ntiles * 2 * out_p * 4)),
    )(z1, sc1, sh1, w2p)

    # Padded rows of z1 are exactly zero, so each padded batch row contributes
    # the constant row relu(sh1) @ w2 to the stage-2 sums — subtract it once
    # wrapper-side instead of masking every tile in the hot loop.
    if pad_count:
        a_pad = jnp.maximum(sh1, 0.0)                              # [1, hid_p]
        pad_row = jnp.dot(a_pad.astype(matmul_dtype), w2p,
                          preferred_element_type=f32)              # [1, out_p]
    else:
        pad_row = None
    sc2, sh2 = _fold_bn(st2, N, g2p, be2p, pad_row=pad_row, pad_count=pad_count)

    # ---- stage 3: out = relu(BN2(z2)) ----------------------------------------
    out = pl.pallas_call(
        _bn_relu_kernel,
        grid=(ntiles,),
        in_specs=[
            pl.BlockSpec((tile_n, out_p), lambda i: (i, 0)),
            pl.BlockSpec((1, out_p), lambda i: (0, 0)),
            pl.BlockSpec((1, out_p), lambda i: (0, 0)),
        ],
        out_specs=pl.BlockSpec((tile_n, out_p), lambda i: (i, 0)),
        out_shape=jax.ShapeDtypeStruct((n_pad, out_p), f32),
        compiler_params=cparams,
        cost_estimate=pl.CostEstimate(
            flops=2 * n_pad * out_p,
            transcendentals=0,
            bytes_accessed=n_pad * out_p * (ib + 4)),
    )(z2, sc2, sh2)

    return out[:N, :out_dim]


# --------------------------------------------------------------------------
# Parameters & reference (PyTorch training-mode forward semantics)
# --------------------------------------------------------------------------
def make_params(key, in_dim, hidden_dim, out_dim):
    k1, k2, k3, k4 = jax.random.split(key, 4)
    scale1 = 1.0 / jnp.sqrt(in_dim)
    scale2 = 1.0 / jnp.sqrt(hidden_dim)
    w1 = jax.random.uniform(k1, (in_dim, hidden_dim), jnp.float32, -scale1, scale1)
    b1 = jax.random.uniform(k2, (1, hidden_dim), jnp.float32, -scale1, scale1)
    w2 = jax.random.uniform(k3, (hidden_dim, out_dim), jnp.float32, -scale2, scale2)
    b2 = jax.random.uniform(k4, (1, out_dim), jnp.float32, -scale2, scale2)
    g1 = jnp.ones((1, hidden_dim), jnp.float32)
    be1 = jnp.zeros((1, hidden_dim), jnp.float32)
    g2 = jnp.ones((1, out_dim), jnp.float32)
    be2 = jnp.zeros((1, out_dim), jnp.float32)
    return w1, b1, g1, be1, w2, b2, g2, be2


def torch_reference(h, w1, b1, g1, be1, w2, b2, g2, be2):
    z1 = h @ w1 + b1
    x1 = (z1 - z1.mean(0, keepdims=True)) * jax.lax.rsqrt(z1.var(0, keepdims=True) + EPS)
    a1 = jnp.maximum(x1 * g1 + be1, 0.0)
    z2 = a1 @ w2 + b2
    x2 = (z2 - z2.mean(0, keepdims=True)) * jax.lax.rsqrt(z2.var(0, keepdims=True) + EPS)
    return jnp.maximum(x2 * g2 + be2, 0.0)


if __name__ == "__main__":
    N, IN_DIM, HIDDEN, OUT_DIM = 200, 16, 32, 32   # multi-tile + ragged last tile

    key = jax.random.PRNGKey(0)
    kh, kp = jax.random.split(key)
    h = jax.random.normal(kh, (N, IN_DIM), jnp.float32)
    params = make_params(kp, IN_DIM, HIDDEN, OUT_DIM)

    ref = torch_reference(h, *params)

    # Full-precision run, small tile -> multi-tile grid + padded-row correction.
    out_f32 = apply_node_func(h, *params, tile_n=64, matmul_dtype=jnp.float32)
    out_f32 = jax.block_until_ready(out_f32)
    assert out_f32.shape == (N, OUT_DIM)
    assert jnp.allclose(out_f32, ref, atol=1e-3, rtol=1e-3)

    # Fast path: bf16 MXU inputs + bf16 intermediates, f32 accumulation/BN math,
    # default (large) tile_n.
    out_bf16 = apply_node_func(h, *params)
    out_bf16 = jax.block_until_ready(out_bf16)
    assert out_bf16.shape == (N, OUT_DIM)
    assert bool(jnp.all(jnp.isfinite(out_bf16)))
    assert jnp.allclose(out_bf16, ref, atol=1e-1, rtol=1e-1)

    # Fast path with a small tile to exercise the multi-tile bf16 pipeline too.
    out_bf16_t = apply_node_func(h, *params, tile_n=64)
    out_bf16_t = jax.block_until_ready(out_bf16_t)
    assert jnp.allclose(out_bf16_t, ref, atol=1e-1, rtol=1e-1)

    print("KERNEL_OK")
</pallas_src>

<mosaic_0001>
module attributes {stable_mosaic.version = 11 : i64} {
  func.func @_linear_stats_kernel(%arg0: i32, %arg1: memref<64x16xf32, #tpu.memory_space<vmem>>, %arg2: memref<16x128xf32, #tpu.memory_space<vmem>>, %arg3: memref<64x128xf32, #tpu.memory_space<vmem>>, %arg4: memref<1x2x128xf32, #tpu.memory_space<vmem>>) attributes {dimension_semantics = [#tpu.dimension_semantics<parallel>], iteration_bounds = array<i64: 4>, scalar_prefetch = 0 : i64, scratch_operands = 0 : i64, tpu.core_type = #tpu.core_type<tc>, window_params = [{transform_indices = @transform_0, window_bounds = array<i64: 64, 16>}, {pipeline_mode = #tpu.pipeline_mode<synchronous>, transform_indices = @transform_1, window_bounds = array<i64: 16, 128>}, {transform_indices = @transform_2, window_bounds = array<i64: 64, 128>}, {transform_indices = @transform_3, window_bounds = array<i64: 1, 2, 128>}]} {
    %c0 = arith.constant 0 : index
    %c0_0 = arith.constant 0 : index
    %0 = vector.load %arg1[%c0, %c0_0] : memref<64x16xf32, #tpu.memory_space<vmem>>, vector<64x16xf32>
    %c0_1 = arith.constant 0 : index
    %c0_2 = arith.constant 0 : index
    %1 = vector.load %arg2[%c0_1, %c0_2] : memref<16x128xf32, #tpu.memory_space<vmem>>, vector<16x128xf32>
    %cst = arith.constant dense<0.000000e+00> : vector<64x128xf32>
    %2 = tpu.matmul %0, %1, %cst {dimension_numbers = #tpu.dot_dimension_numbers<[1], [0], [0], [1], [0, 0, 1, 1], [], []>} : vector<64x16xf32>, vector<16x128xf32>, vector<64x128xf32> -> vector<64x128xf32>
    %c0_3 = arith.constant 0 : index
    %c0_4 = arith.constant 0 : index
    %3 = vector.load %arg3[%c0_3, %c0_4] : memref<64x128xf32, #tpu.memory_space<vmem>>, vector<64x128xf32>
    tpu.vector_store %arg3[%c0_3, %c0_4], %2 {strides = array<i32>} : memref<64x128xf32, #tpu.memory_space<vmem>>, vector<64x128xf32>,
    %cst_5 = arith.constant dense<0.000000e+00> : vector<128xf32>
    %4 = vector.multi_reduction <add>, %2, %cst_5 [0] : vector<64x128xf32> to vector<128xf32>
    %5 = vector.shape_cast %4 : vector<128xf32> to vector<1x128xf32>
    %6 = arith.mulf %2, %2 : vector<64x128xf32>
    %cst_6 = arith.constant dense<0.000000e+00> : vector<128xf32>
    %7 = vector.multi_reduction <add>, %6, %cst_6 [0] : vector<64x128xf32> to vector<128xf32>
    %8 = vector.shape_cast %7 : vector<128xf32> to vector<1x128xf32>
    %9 = tpu.concatenate %5, %8 in 0 : vector<1x128xf32>, vector<1x128xf32> -> vector<2x128xf32>
    %c0_7 = arith.constant 0 : index
    %c0_8 = arith.constant 0 : index
    %c0_9 = arith.constant 0 : index
    %10 = vector.load %arg4[%c0_7, %c0_8, %c0_9] : memref<1x2x128xf32, #tpu.memory_space<vmem>>, vector<1x2x128xf32>
    %11 = vector.shape_cast %10 : vector<1x2x128xf32> to vector<2x128xf32>
    %12 = vector.shape_cast %9 : vector<2x128xf32> to vector<1x2x128xf32>
    tpu.vector_store %arg4[%c0_7, %c0_8, %c0_9], %12 {strides = array<i32>} : memref<1x2x128xf32, #tpu.memory_space<vmem>>, vector<1x2x128xf32>,
    return
  }
  func.func @transform_0(%arg0: i32) -> (i32, i32) {
    %c0_i32 = arith.constant 0 : i32
    %c0_i32_0 = arith.constant 0 : i32
    return %arg0, %c0_i32 : i32, i32
  }
  func.func @transform_1(%arg0: i32) -> (i32, i32) {
    %c0_i32 = arith.constant 0 : i32
    %c0_i32_0 = arith.constant 0 : i32
    %c0_i32_1 = arith.constant 0 : i32
    return %c0_i32, %c0_i32_0 : i32, i32
  }
  func.func @transform_2(%arg0: i32) -> (i32, i32) {
    %c0_i32 = arith.constant 0 : i32
    %c0_i32_0 = arith.constant 0 : i32
    return %arg0, %c0_i32 : i32, i32
  }
  func.func @transform_3(%arg0: i32) -> (i32, i32, i32) {
    %c0_i32 = arith.constant 0 : i32
    %c0_i32_0 = arith.constant 0 : i32
    %c0_i32_1 = arith.constant 0 : i32
    return %arg0, %c0_i32, %c0_i32_0 : i32, i32, i32
  }
}

</mosaic_0001>

<bundles_post_ra>
// kernel: tpu_custom_call.1
= control target key start
LH: loop header
LB: loop body
LE: loop exit
PB: predicated region body
PF: predicated region fallthrough
CT: control target
= control target key end

     0   :  { %9 = vsyncpa [#allocation3], 0  ;;  %s866_s0 = inlined_call_operand.vmem [shape: f32[256,16], index: 0, kind: input, shape index: {}]   ;;  %s867_s1 = inlined_call_operand.vmem [shape: f32[16,128], index: 1, kind: input, shape index: {}]   ;;  %s868_s2 = inlined_call_operand.hbm [shape: f32[256,128], index: 2, kind: output, shape index: {0}]   ;;  %s869_s3 = inlined_call_operand.hbm [shape: f32[4,2,128], index: 3, kind: output, shape index: {1}]  }
   0x1   :  { %11 = vsyncpa [#allocation3 + $0x1], 0 }
   0x2   :  { %12 = vsyncpa [#allocation5], 0 }
   0x3   :  { %14 = vsyncpa [#allocation5 + $0x1], 0  ;;  %s716_s12 = smov 0   ;;  %s718_s13 = smov 0  }
   0x4   :  { %s720_s14 = smov 0   ;;  %s722_s15 = smov 0  }
   0x5 LB: > { %s737_s16 = sadd.s32 4294967295, %s690_s15   ;;  %s494_s17 = sadd.s32 4294967294, %s690_s15   ;;  %s690_s15 = sphi %s722_s15, %s875_s15   ;;  %s686_s14 = sphi %s720_s14, %s874_s14   ;;  %s682_s13 = sphi %s718_s13, %s873_s13   ;;  %s678_s12 = sphi %s716_s12, %s872_s12  }
   0x6   : > { %s741_s18 = sadd.s32 1, %s690_s15   ;;  %s74_s19 = sadd.s32 1, %s686_s14 }
   0x7   : > { %s71_s20 = ssub.s32 %s690_s15, %s741_s18  ;;  %p84_p0 = scmp.ne.s32.totalorder %s686_s14, %s682_s13 }
   0x8   : > { %p72_p1 = scmp.eq.s32.totalorder %s71_s20, 0  ;;  %p85_p2 = scmp.eq.s32.totalorder %s737_s16, 3 }
   0x9   : > { %p90_p3 = scmp.ne.s32.totalorder %s682_s13, %s678_s12  ;;  %p91_p4 = scmp.eq.s32.totalorder %s494_s17, 3 }
   0xa   : > { %s752_s21 = scalar_select %p72_p1, %s686_s14, %s74_s19  }
   0xb   : > { %p754_p5 = por %p85_p2, %p84_p0  ;;  %p758_p6 = por %p91_p4, %p90_p3 }
   0xc   : > { %p497_p7 = scmp.ge.s32.totalorder %s690_s15, 1  ;;  %p147_p8 = scmp.lt.s32.totalorder %s690_s15, 5 }
   0xe   : > { %p148_p9 = pnand %p497_p7, %p147_p8 }
   0xf   : > { %v191_v0 = vld [vmem:[%s867_s1] sm:$0xff] (!%p148_p9)  ;;  %v192_v1 = vld [vmem:[%s867_s1 + $0x8] sm:$0xff] (!%p148_p9)  ;;  %s500_s28 = sshll.u32 (!%p148_p9), %s737_s16, 3  ;;  %vm193_vm0 = vcmask (!%p148_p9), 130048   ;;  %s783_s6 = sand.u32 (!%p148_p9), 1, %s682_s13  }
  0x10   : > { %151 = sbr.rel (%p148_p9) target bundleno = 297 (0x129), region = 28  ;;  %v544_v2 = vpack.c.bf16 (!%p148_p9), %v192_v1, %v191_v0  ;;  %p177_p10 = scmp.lt.s32.totalorder (!%p148_p9), %s500_s28, 31 }
  0x11   : > { %s498_s7 = sshll.u32 (!%p148_p9), %s783_s6, 6  ;;  %s517_s9 = sshll.u32 (!%p148_p9), %s737_s16, 10 }
  0x12   : > { %545 = vmatprep.subr.bf16.mxu0 (!%p148_p9), %v544_v2  ;;  %548 = vmatprep.subr.bf16.mxu1 (!%p148_p9), %v544_v2  ;;  %s168_s8 = scalar_lea.vmem (!%p148_p9), [#allocation2], %s498_s7  ;;  %s790_s19 = scalar_lea.hbm (!%p148_p9), %s868_s2, %s517_s9 }
  0x13   : > { %547 = vmatpush3.bf16.msra.mxu0 (!%p148_p9), %v544_v2  ;;  %549 = vmatpush3.bf16.msra.mxu1 (!%p148_p9), %v544_v2  ;;  %s387_s10 = sshll.u32 (!%p148_p9), %s168_s8, 4  ;;  %s369_s20 = scalar_lea.sflag (!%p148_p9), [#allocation3], %s783_s6  ;;  %s792_s10 = int_to_ptr.vmem [resolvable:$true] %s387_s10 }
  0x14   : > { %s596_s24 = scalar_lea.vmem (!%p148_p9), %s792_s10, 1024  ;;  %s692_s25 = smov (!%p148_p9), [#allocation2]  }
  0x15   : > { %p597_p11 = scmp.ne.s32.totalorder (!%p148_p9), %s792_s10, %s596_s24  ;;  %s600_s26 = sshll.u32 (!%p148_p9), %s692_s25, 4  ;;  %s601_s26 = int_to_ptr.vmem [resolvable:$false] %s600_s26 }
  0x16   : > { %s602_s27 = scalar_lea.vmem (!%p148_p9), %s601_s26, 2048  ;;  %p603_p0 = scmp.lt.s32.totalorder (!%p148_p9), %s792_s10, %s601_s26 }
  0x17   : > { %s877_s28 = smov (!%p177_p10, %s500_s28), 31  ;;  %p598_p12 = pnand %p597_p11, %p754_p5 }
  0x18   : > { %s501_s29 = sshll.u32 %s877_s28, 3  ;;  %p604_p1 = scmp.lt.s32.totalorder %s602_s27, %s596_s24 }
  0x19   : > { %s180_s5 = scalar_lea.vmem %s866_s0, %s501_s29  ;;  %p599_p13 = pneg %p598_p12 }
  0x1a   : > { %v183_v3 = vld [vmem:[%s180_s5] sm:$0xff]  ;;  %v184_v4 = vld [vmem:[%s180_s5 + $0x8] sm:$0xff]  ;;  %v185_v5 = vld [vmem:[%s180_s5 + $0x10] sm:$0xff]  ;;  %p605_p2 = por %p604_p1, %p603_p0 }
  0x1b   : > { %532 = vmatprep.mubr.msk.f32.mxu0 %vm193_vm0, %v183_v3  ;;  %v187_v6 = vld [vmem:[%s180_s5 + $0x20] sm:$0xff]  ;;  %v188_v7 = vld [vmem:[%s180_s5 + $0x28] sm:$0xff]  ;;  %v189_v8 = vld [vmem:[%s180_s5 + $0x30] sm:$0xff] }
  0x1c   : > { %533 = vmatmul.mubr.msk.f32.vlgmr.msra.gmra.mrb[0].mxu0 %vm193_vm0, %v184_v4  ;;  %538 = vmatprep.mubr.msk.f32.mxu1 %vm193_vm0, %v187_v6  ;;  %v186_v9 = vld [vmem:[%s180_s5 + $0x18] sm:$0xff]  ;;  %p606_p3 = pnand %p605_p2, %p599_p13 }
  0x1d   : > { %535 = vmatprep.mubr.msk.f32.mxu0 %vm193_vm0, %v185_v5  ;;  %539 = vmatmul.mubr.msk.f32.vlgmr.msra.gmra.mrb[0].mxu1 %vm193_vm0, %v188_v7  ;;  %v190_v10 = vld [vmem:[%s180_s5 + $0x38] sm:$0xff] }
  0x1e   : > { %541 = vmatprep.mubr.msk.f32.mxu1 %vm193_vm0, %v189_v8 }
  0x20   : > { %536 = vmatmul.mubr.msk.f32.gmra.mrb[2].mxu0 %vm193_vm0, %v186_v9 }
  0x21   : > { %542 = vmatmul.mubr.msk.f32.gmra.mrb[2].mxu1 %vm193_vm0, %v190_v10 }
  0xef   : > { %v534_v11 = vpop.f32.mrb[0].mxu0 }
  0xf0   : > { %324 = vst [vmem:[%s168_s8 + $0x8] sm:$0xff] %v534_v11  ;;  %v345_v12 = vmul.f32 %v534_v11, %v534_v11  ;;  %v284_v13 = vpop.f32.mrb[1].mxu0  ;;  %v540_v14 = vpop.f32.mrb[0].mxu1 }
  0xf1   : > { %323 = vst [vmem:[%s168_s8] sm:$0xff] %v284_v13  ;;  %v331_v15 = vadd.f32 %v534_v11, %v284_v13  ;;  %v344_v16 = vmul.f32 %v284_v13, %v284_v13  ;;  %328 = vst [vmem:[%s168_s8 + $0x28] sm:$0xff] %v540_v14  ;;  %v304_v17 = vpop.f32.mrb[1].mxu1 }
  0xf2   : > { %327 = vst [vmem:[%s168_s8 + $0x20] sm:$0xff] %v304_v17  ;;  %v348_v28 = vmul.f32 %v304_v17, %v304_v17 }
  0xf3   : > { %v352_v18 = vadd.f32 %v345_v12, %v344_v16  ;;  %v537_v19 = vpop.f32.mrb[2].mxu0 }
  0xf4   : > { %326 = vst [vmem:[%s168_s8 + $0x18] sm:$0xff] %v537_v19  ;;  %v294_v20 = vpop.f32.mrb[3].mxu0  ;;  %v543_v21 = vpop.f32.mrb[2].mxu1  ;;  %v347_v25 = vmul.f32 %v537_v19, %v537_v19 }
  0xf5   : > { %325 = vst [vmem:[%s168_s8 + $0x10] sm:$0xff] %v294_v20  ;;  %v332_v22 = vadd.f32 %v331_v15, %v294_v20  ;;  %v346_v23 = vmul.f32 %v294_v20, %v294_v20  ;;  %330 = vst [vmem:[%s168_s8 + $0x38] sm:$0xff] %v543_v21  ;;  %v314_v24 = vpop.f32.mrb[3].mxu1 }
  0xf6   : > { %329 = vst [vmem:[%s168_s8 + $0x30] sm:$0xff] %v314_v24 }
  0xf7   : > { %v333_v26 = vadd.f32 %v537_v19, %v332_v22  ;;  %v353_v27 = vadd.f32 %v352_v18, %v346_v23 }
  0xf8   : > { %609 = shalt.err (!%p606_p3)
}
  0xf9   : > { %s610_s28 = scalar_lea.hbm %s790_s19, 1024  ;;  %s614_s4 = scalar_lea.hbm %s868_s2, 4096 }
  0xfa   : > { %p611_p4 = scmp.ne.s32.totalorder %s790_s19, %s610_s28  ;;  %p615_p9 = scmp.lt.u32.totalorder %s790_s19, %s868_s2 }
  0xfb   : > { %p616_p10 = scmp.lt.u32.totalorder %s614_s4, %s610_s28  ;;  %p618_p12 = scmp.lt.u32.totalorder %s610_s28, %s790_s19 }
  0xfc   : > { %p612_p7 = pnand %p611_p4, %p754_p5 }
  0xfd   : > { %p617_p11 = por %p616_p10, %p615_p9 }
  0xfe   : > { %p613_p8 = pneg %p612_p7 }
  0xff   : > { %p619_p13 = por %p618_p12, %p617_p11 }
 0x101   : > { %p620_p0 = pnand %p619_p13, %p613_p8 }
 0x103   : > { %623 = shalt.err (!%p620_p0)
}
 0x104   : > { %s693_s8 = smov 128   ;;  %s694_s9 = smov 8   ;;  %v354_v29 = vadd.f32 %v353_v27, %v347_v25  ;;  %v334_v30 = vadd.f32 %v333_v26, %v304_v17  ;;  %v349_v31 = vmul.f32 %v540_v14, %v540_v14  ;;  %v350_v34 = vmul.f32 %v314_v24, %v314_v24 }
 0x105   : > { %550 = dma.vmem_to_hbm [thread:$0]  (%p754_p5), %s792_s10, 1024, %s790_s19, %s369_s20, %s693_s8, %s693_s8, %s694_s9   ;;  %v351_v37 = vmul.f32 %v543_v21, %v543_v21  ;;  %vm365_vm1 = vcmask 1040384  }
 0x106   : > { %v355_v32 = vadd.f32 %v354_v29, %v348_v28  ;;  %v335_v33 = vadd.f32 %v540_v14, %v334_v30  ;;  %s499_s10 = sshll.u32 %s783_s6, 1  ;;  %s514_s11 = sshll.u32 %s737_s16, 5 }
 0x107   : > { %s175_s17 = scalar_lea.vmem [#allocation4], %s499_s10  ;;  %s823_s25 = scalar_lea.hbm %s869_s3, %s514_s11 }
 0x108   : > { %v336_v35 = vadd.f32 %v335_v33, %v314_v24  ;;  %v356_v36 = vadd.f32 %v355_v32, %v349_v31  ;;  %s403_s19 = sshll.u32 %s175_s17, 4  ;;  %s374_s26 = scalar_lea.sflag [#allocation5], %s783_s6  ;;  %s825_s19 = int_to_ptr.vmem [resolvable:$true] %s403_s19 }
 0x109   : > { %s624_s27 = scalar_lea.vmem %s825_s19, 32  ;;  %s695_s16 = smov [#allocation4]  }
 0x10a   : > { %v337_v38 = vadd.f32 %v543_v21, %v336_v35  ;;  %v357_v39 = vadd.f32 %v356_v36, %v350_v34  ;;  %p625_p1 = scmp.ne.s32.totalorder %s825_s19, %s624_s27  ;;  %s628_s28 = sshll.u32 %s695_s16, 4  ;;  %s629_s28 = int_to_ptr.vmem [resolvable:$false] %s628_s28 }
 0x10b   : > { %s630_s29 = scalar_lea.vmem %s629_s28, 64  ;;  %p631_p4 = scmp.lt.s32.totalorder %s825_s19, %s629_s28 }
 0x10c   : > { %v338_v40 = vrot.slane %v337_v38, 4  ;;  %v358_v41 = vadd.f32 %v357_v39, %v351_v37  ;;  %p626_p2 = pnand %p625_p1, %p754_p5  ;;  %p632_p7 = scmp.lt.s32.totalorder %s630_s29, %s624_s27 }
 0x10e   : > { %v339_v42 = vadd.f32 %v338_v40, %v337_v38  ;;  %v359_v43 = vrot.slane %v358_v41, 4  ;;  %p627_p3 = pneg %p626_p2  ;;  %p633_p8 = por %p632_p7, %p631_p4 }
 0x110   : > { %v340_v44 = vrot.slane %v339_v42, 2  ;;  %v360_v45 = vadd.f32 %v359_v43, %v358_v41  ;;  %p634_p9 = pnand %p633_p8, %p627_p3 }
 0x112   : > { %v341_v46 = vadd.f32 %v340_v44, %v339_v42  ;;  %v361_v47 = vrot.slane %v360_v45, 2 }
 0x114   : > { %v342_v48 = vrot.slane %v341_v46, 1  ;;  %v362_v49 = vadd.f32 %v361_v47, %v360_v45 }
 0x116   : > { %v363_v50 = vrot.slane %v362_v49, 1  ;;  %v343_v51 = vadd.f32 %v342_v48, %v341_v46 }
 0x118   : > { %v364_v52 = vadd.f32 %v363_v50, %v362_v49 }
 0x11a   : > { %v366_v53 = vsel %vm365_vm1, %v343_v51, %v364_v52 }
 0x11b   : > { %367 = vst [vmem:[%s175_s17] sm:$0x3] %v366_v53 }
 0x11c   : > { %637 = shalt.err (!%p634_p9)
}
 0x11d   : > { %s638_s6 = scalar_lea.hbm %s823_s25, 32  ;;  %s642_s5 = scalar_lea.hbm %s869_s3, 128 }
 0x11e   : > { %p639_p10 = scmp.ne.s32.totalorder %s823_s25, %s638_s6  ;;  %p643_p13 = scmp.lt.u32.totalorder %s823_s25, %s869_s3 }
 0x11f   : > { %p644_p0 = scmp.lt.u32.totalorder %s642_s5, %s638_s6  ;;  %p646_p2 = scmp.lt.u32.totalorder %s638_s6, %s823_s25 }
 0x120   : > { %p640_p11 = pnand %p639_p10, %p754_p5 }
 0x121   : > { %p645_p1 = por %p644_p0, %p643_p13 }
 0x122   : > { %p641_p12 = pneg %p640_p11 }
 0x123   : > { %p647_p3 = por %p646_p2, %p645_p1 }
 0x125   : > { %p648_p4 = pnand %p647_p3, %p641_p12 }
 0x127   : > { %651 = shalt.err (!%p648_p4)
}
 0x128   : > { %551 = dma.vmem_to_hbm [thread:$0]  (%p754_p5), %s825_s19, 32, %s823_s25, %s374_s26  }
 0x129 PF: > { %p561_p7 = scmp.ge.s32.totalorder %s690_s15, 2  ;;  %s415_s9 = sand.u32 1, %s678_s12  }
 0x12a   : > { %s416_s10 = scalar_lea.sflag [#allocation3], %s415_s9 }
 0x12b   : > { %p555_p8 = pnand %p561_p7, %p758_p6 }
 0x12d   : > { %669 = dma.done.wait (!%p555_p8), %s416_s10, 1024  }
 0x12e   : > { %671 = vsyncadd (!%p555_p8), %s416_s10, 4294966272  ;;  %s425_s11 = scalar_lea.sflag [#allocation5], %s415_s9 }
 0x12f   : > { %673 = dma.done.wait (!%p555_p8), %s425_s11, 32  }
 0x130   : > { %675 = vsyncadd (!%p555_p8), %s425_s11, 4294967264  ;;  %p17_p5 = scmp.ge.s32.totalorder %s741_s18, 6   ;;  %s872_s12 = smov %s682_s13 }
 0x131   : > { %s873_s13 = smov %s686_s14  ;;  %s874_s14 = smov %s752_s21 }
 0x132   : > { %s875_s15 = smov %s741_s18  ;;  %19 = sbr.rel (!%p17_p5) target bundleno = 5 (0x5), region = 80 }
 0x139   :  { %430 = vsyncpa [#allocation3], 1 }
 0x13a   :  { %432 = vsyncpa [#allocation3 + $0x1], 1 }
 0x13b   :  { %433 = vsyncpa [#allocation5], 1 }
 0x13c   :  { %435 = vsyncpa [#allocation5 + $0x1], 1 }

</bundles_post_ra>
